<compile_context>
chip_gen: v5e
topology: v5e:2x2
jax: 0.10.0
libtpu: 0.0.40
codegen_flags: <defaults>
</compile_context>

<pallas_src>
import math
import functools

import numpy as np
import jax
import jax.numpy as jnp
from jax import lax
from jax.experimental import pallas as pl
from jax.experimental.pallas import tpu as pltpu

_NEG_INF = -1e30            # large finite negative: exp underflows to 0, no inf-inf NaNs
_VMEM_LIMIT_BYTES = 32 * 1024 * 1024


def _pick_tile(n, preferred):
    """Largest multiple-of-8 divisor of n that is <= preferred (or n itself)."""
    if n <= preferred:
        return n
    for t in range(preferred, 7, -8):
        if n % t == 0:
            return t
    return n


def _interleave_q(qi, nq):
    """Bijective permutation of q-block indices: pairs low-work (early) and
    high-work (late) causal q blocks so contiguous halves of the 'parallel'
    q grid axis carry balanced work across v7x's two TensorCores."""
    half = qi // 2
    odd = qi % 2
    return odd * (nq - 1 - half) + (1 - odd) * half


def _default_exp_dtype():
    """bf16 exp on chips with a bf16 EUP (v6e/v7x); f32 elsewhere (v5e/v4)."""
    try:
        kind = jax.devices()[0].device_kind.lower()
    except Exception:
        return jnp.float32
    if "v6" in kind or "v7" in kind:
        return jnp.bfloat16
    return jnp.float32


# --------------------------------------------------------------------------
# Kernel 1: fused QKV projection (one wide matmul), (H, S, d) outputs
# --------------------------------------------------------------------------
def _qkv_proj_kernel(x_ref, w_ref, q_ref, k_ref, v_ref, *, n_heads, d_k, d_v):
    x = x_ref[...]                                                    # (ts, d_model)
    y = jnp.dot(x, w_ref[...], preferred_element_type=jnp.float32)   # (ts, 2*hdk+hdv)
    hdk = n_heads * d_k
    # Head split paid once per seq tile (amortized over all kv steps of kernel 2).
    for h in range(n_heads):
        q_ref[h] = y[:, h * d_k:(h + 1) * d_k].astype(q_ref.dtype)
        k_ref[h] = y[:, hdk + h * d_k: hdk + (h + 1) * d_k].astype(k_ref.dtype)
        v_ref[h] = y[:, 2 * hdk + h * d_v: 2 * hdk + (h + 1) * d_v].astype(v_ref.dtype)


# --------------------------------------------------------------------------
# Kernel 2: causal flash attention (head-batched) + fused output projection
# --------------------------------------------------------------------------
def _flash_attn_proj_kernel(q_ref, k_ref, v_ref, wp_ref, b_ref, o_ref,
                            m_sc, l_sc, acc_sc, *,
                            n_heads, q_tile, kv_tile, nq, exp_dtype, approx_recip):
    qi = pl.program_id(0)
    ki = pl.program_id(1)
    nk = pl.num_programs(1)

    q_blk = _interleave_q(qi, nq)          # actual (permuted) q block index
    q_start = q_blk * q_tile
    kv_start = ki * kv_tile

    @pl.when(ki == 0)
    def _init():
        m_sc[...] = jnp.full_like(m_sc, _NEG_INF)
        l_sc[...] = jnp.zeros_like(l_sc)
        acc_sc[...] = jnp.zeros_like(acc_sc)

    def _step(masked):
        q = q_ref[...]                     # (H, tq, d_k), pre-scaled by 1/sqrt(d_k)
        k = k_ref[...]                     # (H, tkv, d_k)
        v = v_ref[...]                     # (H, tkv, d_v)

        # Head-batched score matmul: contraction on last dims, no transposes,
        # no per-head lane slicing.
        s = jnp.einsum('hqd,hkd->hqk', q, k,
                       preferred_element_type=jnp.float32)            # (H, tq, tkv) f32
        if masked:
            row = q_start + lax.broadcasted_iota(jnp.int32, (q_tile, kv_tile), 0)
            col = kv_start + lax.broadcasted_iota(jnp.int32, (q_tile, kv_tile), 1)
            s = jnp.where((col <= row)[None, :, :], s, _NEG_INF)

        m_prev = m_sc[...]                                             # (H, tq, 1)
        m_new = jnp.maximum(m_prev, jnp.max(s, axis=-1, keepdims=True))
        alpha = jnp.exp(m_prev - m_new)                                # f32 (tiny)
        # bf16 exp on v6e/v7x (EUP packs 2/lane); f32 on v5e.
        p = jnp.exp((s - m_new).astype(exp_dtype))
        # Row-sum always accumulated in f32.
        l_sc[...] = alpha * l_sc[...] + jnp.sum(p.astype(jnp.float32),
                                                axis=-1, keepdims=True)
        acc_sc[...] = alpha * acc_sc[...] + jnp.einsum(
            'hqk,hkd->hqd', p.astype(v.dtype), v,
            preferred_element_type=jnp.float32)
        m_sc[...] = m_new

    # Diagonal-crossing kv blocks: need the causal select.
    @pl.when((kv_start <= q_start + q_tile - 1) &
             (kv_start + kv_tile - 1 > q_start))
    def _masked():
        _step(masked=True)

    # Fully at/below-diagonal blocks: mask would be all-True -> skip the
    # iota build and vselects entirely.
    @pl.when(kv_start + kv_tile - 1 <= q_start)
    def _unmasked():
        _step(masked=False)

    # (kv blocks strictly above the diagonal fall through: no compute, and the
    #  clamped kv index_map suppressed their DMA.)

    @pl.when(ki == nk - 1)
    def _finalize():
        if approx_recip:
            z = acc_sc[...] * pl.reciprocal(l_sc[...], approx=True)    # (H, tq, d_v)
        else:
            z = acc_sc[...] / l_sc[...]                                # exact f32 parity
        # Output projection: sum_h z[h] @ Wp[h]  (no lane concat / relayout).
        out = jnp.dot(z[0].astype(wp_ref.dtype), wp_ref[0],
                      preferred_element_type=jnp.float32)
        for h in range(1, n_heads):
            out = out + jnp.dot(z[h].astype(wp_ref.dtype), wp_ref[h],
                                preferred_element_type=jnp.float32)
        o_ref[...] = (out + b_ref[...]).astype(o_ref.dtype)


# --------------------------------------------------------------------------
# Wrapper
# --------------------------------------------------------------------------
def multi_head_masked_self_attention(x, wq, wk, wv, w_proj, b_proj, *, d_k,
                                     compute_dtype=jnp.bfloat16,
                                     out_dtype=None,
                                     exp_dtype=None,
                                     q_tile=256, kv_tile=128):
    """x: (S, d_model); wq/wk: (H, d_k, d_model); wv: (H, d_v, d_model);
    w_proj: (d_model, H*d_v); b_proj: (d_model,). Returns (S, d_model) out_dtype."""
    n_heads, _, d_model = wq.shape
    d_v = wv.shape[1]
    S = x.shape[0]
    scaling = math.sqrt(d_k)
    hdk = n_heads * d_k
    hdv = n_heads * d_v

    is_f32 = np.dtype(compute_dtype) == np.dtype(np.float32)
    if out_dtype is None:
        out_dtype = compute_dtype
    if exp_dtype is None:
        exp_dtype = jnp.float32 if is_f32 else _default_exp_dtype()
    approx_recip = not is_f32   # exact divide for strict f32 parity

    # Pack [Wq | Wk | Wv] (all heads) along lanes; pre-transpose from
    # nn.Linear's (out, in); fold 1/sqrt(d_k) into Wq.
    wq_p = jnp.transpose(wq, (2, 0, 1)).reshape(d_model, hdk) / scaling
    wk_p = jnp.transpose(wk, (2, 0, 1)).reshape(d_model, hdk)
    wv_p = jnp.transpose(wv, (2, 0, 1)).reshape(d_model, hdv)
    w_all = jnp.concatenate([wq_p, wk_p, wv_p], axis=1).astype(compute_dtype)
    wp_p = w_proj.T.reshape(n_heads, d_v, d_model).astype(compute_dtype)   # (H, d_v, d_model)
    bias2d = b_proj.reshape(1, d_model).astype(jnp.float32)

    x_c = x.astype(compute_dtype)

    ts = _pick_tile(S, 256)
    tq = _pick_tile(S, q_tile)
    tkv = _pick_tile(S, kv_tile)
    nq, nk = S // tq, S // tkv

    # ---- Kernel 1: fused Q/K/V projection, (H, S, d) outputs ----
    qkv_kernel = functools.partial(_qkv_proj_kernel,
                                   n_heads=n_heads, d_k=d_k, d_v=d_v)
    q, k, v = pl.pallas_call(
        qkv_kernel,
        out_shape=(jax.ShapeDtypeStruct((n_heads, S, d_k), compute_dtype),
                   jax.ShapeDtypeStruct((n_heads, S, d_k), compute_dtype),
                   jax.ShapeDtypeStruct((n_heads, S, d_v), compute_dtype)),
        grid_spec=pltpu.PrefetchScalarGridSpec(
            num_scalar_prefetch=0,
            grid=(S // ts,),
            in_specs=[
                pl.BlockSpec((ts, d_model), lambda i: (i, 0)),
                pl.BlockSpec((d_model, 2 * hdk + hdv), lambda i: (0, 0)),
            ],
            out_specs=[
                pl.BlockSpec((n_heads, ts, d_k), lambda i: (0, i, 0)),
                pl.BlockSpec((n_heads, ts, d_k), lambda i: (0, i, 0)),
                pl.BlockSpec((n_heads, ts, d_v), lambda i: (0, i, 0)),
            ],
        ),
        compiler_params=pltpu.CompilerParams(
            dimension_semantics=("parallel",),
            vmem_limit_bytes=_VMEM_LIMIT_BYTES),
    )(x_c, w_all)

    # ---- Kernel 2: flash attention + output projection ----
    def q_index(qi, ki):
        return (0, _interleave_q(qi, nq), 0)

    def kv_index(qi, ki):
        # Clamp so kv blocks above the causal diagonal reuse the previously
        # fetched block (no wasted DMA); their compute is skipped in-kernel.
        q_blk = _interleave_q(qi, nq)
        last = (q_blk * tq + tq - 1) // tkv
        return (0, jnp.minimum(ki, last), 0)

    def o_index(qi, ki):
        return (_interleave_q(qi, nq), 0)

    attn_kernel = functools.partial(
        _flash_attn_proj_kernel,
        n_heads=n_heads, q_tile=tq, kv_tile=tkv, nq=nq,
        exp_dtype=exp_dtype, approx_recip=approx_recip)

    return pl.pallas_call(
        attn_kernel,
        out_shape=jax.ShapeDtypeStruct((S, d_model), out_dtype),
        grid_spec=pltpu.PrefetchScalarGridSpec(
            num_scalar_prefetch=0,
            grid=(nq, nk),
            in_specs=[
                pl.BlockSpec((n_heads, tq, d_k), q_index),
                pl.BlockSpec((n_heads, tkv, d_k), kv_index),
                pl.BlockSpec((n_heads, tkv, d_v), kv_index),
                pl.BlockSpec((n_heads, d_v, d_model), lambda qi, ki: (0, 0, 0)),
                pl.BlockSpec((1, d_model), lambda qi, ki: (0, 0)),
            ],
            out_specs=pl.BlockSpec((tq, d_model), o_index),
            scratch_shapes=[
                pltpu.VMEM((n_heads, tq, 1), jnp.float32),    # running max
                pltpu.VMEM((n_heads, tq, 1), jnp.float32),    # running sum
                pltpu.VMEM((n_heads, tq, d_v), jnp.float32),  # accumulator
            ],
        ),
        compiler_params=pltpu.CompilerParams(
            dimension_semantics=("parallel", "arbitrary"),
            vmem_limit_bytes=_VMEM_LIMIT_BYTES),
    )(q, k, v, wp_p, bias2d)


# --------------------------------------------------------------------------
# Pure-JAX reference (matches the PyTorch forward, eval mode)
# --------------------------------------------------------------------------
def _reference(x, wq, wk, wv, w_proj, b_proj, d_k):
    S = x.shape[0]
    mask = jnp.tril(jnp.ones((S, S))) == 0
    outs = []
    for h in range(wq.shape[0]):
        q = x @ wq[h].T
        k = x @ wk[h].T
        v = x @ wv[h].T
        scores = (q @ k.T) / math.sqrt(d_k)
        scores = jnp.where(mask, -jnp.inf, scores)
        w = jax.nn.softmax(scores, axis=1)
        outs.append(w @ v)
    zcat = jnp.concatenate(outs, axis=1)
    return zcat @ w_proj.T + b_proj


if __name__ == "__main__":
    def make_params(key, n_heads, d_model, d_k, d_v):
        kq, kk, kv, kp, kb = jax.random.split(key, 5)
        bound_qk = math.sqrt(6.0 / (d_model + d_k))
        bound_v = math.sqrt(6.0 / (d_model + d_v))
        wq = jax.random.uniform(kq, (n_heads, d_k, d_model), jnp.float32, -bound_qk, bound_qk)
        wk = jax.random.uniform(kk, (n_heads, d_k, d_model), jnp.float32, -bound_qk, bound_qk)
        wv = jax.random.uniform(kv, (n_heads, d_v, d_model), jnp.float32, -bound_v, bound_v)
        bp = 1.0 / math.sqrt(n_heads * d_v)
        w_proj = jax.random.uniform(kp, (d_model, n_heads * d_v), jnp.float32, -bp, bp)
        b_proj = jax.random.uniform(kb, (d_model,), jnp.float32, -bp, bp)
        return wq, wk, wv, w_proj, b_proj

    key = jax.random.PRNGKey(0)
    k1, k2, kx1, kx2 = jax.random.split(key, 4)

    # --- Config 1: the module's own small shapes (single-tile grid) ---
    n_heads, d_model, d_k, d_v, S = 4, 32, 16, 16, 8
    wq, wk, wv, w_proj, b_proj = make_params(k1, n_heads, d_model, d_k, d_v)
    x = jax.random.normal(kx1, (S, d_model), jnp.float32)
    z_ref = _reference(x, wq, wk, wv, w_proj, b_proj, d_k)

    z32 = jax.block_until_ready(
        multi_head_masked_self_attention(x, wq, wk, wv, w_proj, b_proj, d_k=d_k,
                                         compute_dtype=jnp.float32))
    assert jnp.allclose(z32, z_ref, atol=5e-3, rtol=5e-3), "f32 mismatch vs reference (small)"

    zbf = jax.block_until_ready(
        multi_head_masked_self_attention(x, wq, wk, wv, w_proj, b_proj, d_k=d_k))
    assert jnp.allclose(zbf.astype(jnp.float32), z_ref, atol=5e-2, rtol=5e-2), \
        "bf16 mismatch vs reference (small)"

    # --- Config 2: multi-tile grid (online softmax, causal skip, q-block interleave) ---
    n_heads, d_model, d_k, d_v, S = 4, 128, 32, 32, 512
    wq, wk, wv, w_proj, b_proj = make_params(k2, n_heads, d_model, d_k, d_v)
    x = jax.random.normal(kx2, (S, d_model), jnp.float32)
    z_ref = _reference(x, wq, wk, wv, w_proj, b_proj, d_k)

    # Strict f32 path, 4x4 grid (exercises the permuted q mapping + all causal branches).
    z32 = jax.block_until_ready(
        multi_head_masked_self_attention(x, wq, wk, wv, w_proj, b_proj, d_k=d_k,
                                         compute_dtype=jnp.float32,
                                         q_tile=128, kv_tile=128))
    assert jnp.allclose(z32, z_ref, atol=5e-3, rtol=5e-3), "f32 mismatch vs reference (tiled)"

    # Default path: bf16 operands/output, q_tile=256, kv_tile=128, bf16 exp on v6e/v7x.
    zbf = jax.block_until_ready(
        multi_head_masked_self_attention(x, wq, wk, wv, w_proj, b_proj, d_k=d_k))
    assert jnp.allclose(zbf.astype(jnp.float32), z_ref, atol=1e-1, rtol=5e-2), \
        "bf16 mismatch vs reference (tiled)"

    print("KERNEL_OK")
</pallas_src>

<mosaic_0001>
module attributes {stable_mosaic.version = 11 : i64} {
  func.func @_qkv_proj_kernel(%arg0: i32, %arg1: memref<8x32xf32, #tpu.memory_space<vmem>>, %arg2: memref<32x192xf32, #tpu.memory_space<vmem>>, %arg3: memref<4x8x16xf32, #tpu.memory_space<vmem>>, %arg4: memref<4x8x16xf32, #tpu.memory_space<vmem>>, %arg5: memref<4x8x16xf32, #tpu.memory_space<vmem>>) attributes {dimension_semantics = [#tpu.dimension_semantics<parallel>], iteration_bounds = array<i64: 1>, scalar_prefetch = 0 : i64, scratch_operands = 0 : i64, tpu.core_type = #tpu.core_type<tc>, window_params = [{transform_indices = @transform_0, window_bounds = array<i64: 8, 32>}, {pipeline_mode = #tpu.pipeline_mode<synchronous>, transform_indices = @transform_1, window_bounds = array<i64: 32, 192>}, {transform_indices = @transform_2, window_bounds = array<i64: 4, 8, 16>}, {transform_indices = @transform_3, window_bounds = array<i64: 4, 8, 16>}, {transform_indices = @transform_4, window_bounds = array<i64: 4, 8, 16>}]} {
    %c0 = arith.constant 0 : index
    %c0_0 = arith.constant 0 : index
    %0 = vector.load %arg1[%c0, %c0_0] : memref<8x32xf32, #tpu.memory_space<vmem>>, vector<8x32xf32>
    %c0_1 = arith.constant 0 : index
    %c0_2 = arith.constant 0 : index
    %1 = vector.load %arg2[%c0_1, %c0_2] : memref<32x192xf32, #tpu.memory_space<vmem>>, vector<32x192xf32>
    %cst = arith.constant dense<0.000000e+00> : vector<8x192xf32>
    %2 = tpu.matmul %0, %1, %cst {dimension_numbers = #tpu.dot_dimension_numbers<[1], [0], [0], [1], [0, 0, 1, 1], [], []>} : vector<8x32xf32>, vector<32x192xf32>, vector<8x192xf32> -> vector<8x192xf32>
    %3 = vector.extract_strided_slice %2 {offsets = [0, 0], sizes = [8, 16], strides = [1, 1]} : vector<8x192xf32> to vector<8x16xf32>
    %c0_3 = arith.constant 0 : index
    %c0_4 = arith.constant 0 : index
    %c0_5 = arith.constant 0 : index
    %4 = vector.load %arg3[%c0_3, %c0_4, %c0_5] : memref<4x8x16xf32, #tpu.memory_space<vmem>>, vector<1x8x16xf32>
    %5 = vector.shape_cast %4 : vector<1x8x16xf32> to vector<8x16xf32>
    %6 = vector.shape_cast %3 : vector<8x16xf32> to vector<1x8x16xf32>
    tpu.vector_store %arg3[%c0_3, %c0_4, %c0_5], %6 {strides = array<i32>} : memref<4x8x16xf32, #tpu.memory_space<vmem>>, vector<1x8x16xf32>,
    %7 = vector.extract_strided_slice %2 {offsets = [0, 64], sizes = [8, 16], strides = [1, 1]} : vector<8x192xf32> to vector<8x16xf32>
    %c0_6 = arith.constant 0 : index
    %c0_7 = arith.constant 0 : index
    %c0_8 = arith.constant 0 : index
    %8 = vector.load %arg4[%c0_6, %c0_7, %c0_8] : memref<4x8x16xf32, #tpu.memory_space<vmem>>, vector<1x8x16xf32>
    %9 = vector.shape_cast %8 : vector<1x8x16xf32> to vector<8x16xf32>
    %10 = vector.shape_cast %7 : vector<8x16xf32> to vector<1x8x16xf32>
    tpu.vector_store %arg4[%c0_6, %c0_7, %c0_8], %10 {strides = array<i32>} : memref<4x8x16xf32, #tpu.memory_space<vmem>>, vector<1x8x16xf32>,
    %11 = vector.extract_strided_slice %2 {offsets = [0, 128], sizes = [8, 16], strides = [1, 1]} : vector<8x192xf32> to vector<8x16xf32>
    %c0_9 = arith.constant 0 : index
    %c0_10 = arith.constant 0 : index
    %c0_11 = arith.constant 0 : index
    %12 = vector.load %arg5[%c0_9, %c0_10, %c0_11] : memref<4x8x16xf32, #tpu.memory_space<vmem>>, vector<1x8x16xf32>
    %13 = vector.shape_cast %12 : vector<1x8x16xf32> to vector<8x16xf32>
    %14 = vector.shape_cast %11 : vector<8x16xf32> to vector<1x8x16xf32>
    tpu.vector_store %arg5[%c0_9, %c0_10, %c0_11], %14 {strides = array<i32>} : memref<4x8x16xf32, #tpu.memory_space<vmem>>, vector<1x8x16xf32>,
    %15 = vector.extract_strided_slice %2 {offsets = [0, 16], sizes = [8, 16], strides = [1, 1]} : vector<8x192xf32> to vector<8x16xf32>
    %c1 = arith.constant 1 : index
    %c0_12 = arith.constant 0 : index
    %c0_13 = arith.constant 0 : index
    %16 = vector.load %arg3[%c1, %c0_12, %c0_13] : memref<4x8x16xf32, #tpu.memory_space<vmem>>, vector<1x8x16xf32>
    %17 = vector.shape_cast %16 : vector<1x8x16xf32> to vector<8x16xf32>
    %18 = vector.shape_cast %15 : vector<8x16xf32> to vector<1x8x16xf32>
    tpu.vector_store %arg3[%c1, %c0_12, %c0_13], %18 {strides = array<i32>} : memref<4x8x16xf32, #tpu.memory_space<vmem>>, vector<1x8x16xf32>,
    %19 = vector.extract_strided_slice %2 {offsets = [0, 80], sizes = [8, 16], strides = [1, 1]} : vector<8x192xf32> to vector<8x16xf32>
    %c1_14 = arith.constant 1 : index
    %c0_15 = arith.constant 0 : index
    %c0_16 = arith.constant 0 : index
    %20 = vector.load %arg4[%c1_14, %c0_15, %c0_16] : memref<4x8x16xf32, #tpu.memory_space<vmem>>, vector<1x8x16xf32>
    %21 = vector.shape_cast %20 : vector<1x8x16xf32> to vector<8x16xf32>
    %22 = vector.shape_cast %19 : vector<8x16xf32> to vector<1x8x16xf32>
    tpu.vector_store %arg4[%c1_14, %c0_15, %c0_16], %22 {strides = array<i32>} : memref<4x8x16xf32, #tpu.memory_space<vmem>>, vector<1x8x16xf32>,
    %23 = vector.extract_strided_slice %2 {offsets = [0, 144], sizes = [8, 16], strides = [1, 1]} : vector<8x192xf32> to vector<8x16xf32>
    %c1_17 = arith.constant 1 : index
    %c0_18 = arith.constant 0 : index
    %c0_19 = arith.constant 0 : index
    %24 = vector.load %arg5[%c1_17, %c0_18, %c0_19] : memref<4x8x16xf32, #tpu.memory_space<vmem>>, vector<1x8x16xf32>
    %25 = vector.shape_cast %24 : vector<1x8x16xf32> to vector<8x16xf32>
    %26 = vector.shape_cast %23 : vector<8x16xf32> to vector<1x8x16xf32>
    tpu.vector_store %arg5[%c1_17, %c0_18, %c0_19], %26 {strides = array<i32>} : memref<4x8x16xf32, #tpu.memory_space<vmem>>, vector<1x8x16xf32>,
    %27 = vector.extract_strided_slice %2 {offsets = [0, 32], sizes = [8, 16], strides = [1, 1]} : vector<8x192xf32> to vector<8x16xf32>
    %c2 = arith.constant 2 : index
    %c0_20 = arith.constant 0 : index
    %c0_21 = arith.constant 0 : index
    %28 = vector.load %arg3[%c2, %c0_20, %c0_21] : memref<4x8x16xf32, #tpu.memory_space<vmem>>, vector<1x8x16xf32>
    %29 = vector.shape_cast %28 : vector<1x8x16xf32> to vector<8x16xf32>
    %30 = vector.shape_cast %27 : vector<8x16xf32> to vector<1x8x16xf32>
    tpu.vector_store %arg3[%c2, %c0_20, %c0_21], %30 {strides = array<i32>} : memref<4x8x16xf32, #tpu.memory_space<vmem>>, vector<1x8x16xf32>,
    %31 = vector.extract_strided_slice %2 {offsets = [0, 96], sizes = [8, 16], strides = [1, 1]} : vector<8x192xf32> to vector<8x16xf32>
    %c2_22 = arith.constant 2 : index
    %c0_23 = arith.constant 0 : index
    %c0_24 = arith.constant 0 : index
    %32 = vector.load %arg4[%c2_22, %c0_23, %c0_24] : memref<4x8x16xf32, #tpu.memory_space<vmem>>, vector<1x8x16xf32>
    %33 = vector.shape_cast %32 : vector<1x8x16xf32> to vector<8x16xf32>
    %34 = vector.shape_cast %31 : vector<8x16xf32> to vector<1x8x16xf32>
    tpu.vector_store %arg4[%c2_22, %c0_23, %c0_24], %34 {strides = array<i32>} : memref<4x8x16xf32, #tpu.memory_space<vmem>>, vector<1x8x16xf32>,
    %35 = vector.extract_strided_slice %2 {offsets = [0, 160], sizes = [8, 16], strides = [1, 1]} : vector<8x192xf32> to vector<8x16xf32>
    %c2_25 = arith.constant 2 : index
    %c0_26 = arith.constant 0 : index
    %c0_27 = arith.constant 0 : index
    %36 = vector.load %arg5[%c2_25, %c0_26, %c0_27] : memref<4x8x16xf32, #tpu.memory_space<vmem>>, vector<1x8x16xf32>
    %37 = vector.shape_cast %36 : vector<1x8x16xf32> to vector<8x16xf32>
    %38 = vector.shape_cast %35 : vector<8x16xf32> to vector<1x8x16xf32>
    tpu.vector_store %arg5[%c2_25, %c0_26, %c0_27], %38 {strides = array<i32>} : memref<4x8x16xf32, #tpu.memory_space<vmem>>, vector<1x8x16xf32>,
    %39 = vector.extract_strided_slice %2 {offsets = [0, 48], sizes = [8, 16], strides = [1, 1]} : vector<8x192xf32> to vector<8x16xf32>
    %c3 = arith.constant 3 : index
    %c0_28 = arith.constant 0 : index
    %c0_29 = arith.constant 0 : index
    %40 = vector.load %arg3[%c3, %c0_28, %c0_29] : memref<4x8x16xf32, #tpu.memory_space<vmem>>, vector<1x8x16xf32>
    %41 = vector.shape_cast %40 : vector<1x8x16xf32> to vector<8x16xf32>
    %42 = vector.shape_cast %39 : vector<8x16xf32> to vector<1x8x16xf32>
    tpu.vector_store %arg3[%c3, %c0_28, %c0_29], %42 {strides = array<i32>} : memref<4x8x16xf32, #tpu.memory_space<vmem>>, vector<1x8x16xf32>,
    %43 = vector.extract_strided_slice %2 {offsets = [0, 112], sizes = [8, 16], strides = [1, 1]} : vector<8x192xf32> to vector<8x16xf32>
    %c3_30 = arith.constant 3 : index
    %c0_31 = arith.constant 0 : index
    %c0_32 = arith.constant 0 : index
    %44 = vector.load %arg4[%c3_30, %c0_31, %c0_32] : memref<4x8x16xf32, #tpu.memory_space<vmem>>, vector<1x8x16xf32>
    %45 = vector.shape_cast %44 : vector<1x8x16xf32> to vector<8x16xf32>
    %46 = vector.shape_cast %43 : vector<8x16xf32> to vector<1x8x16xf32>
    tpu.vector_store %arg4[%c3_30, %c0_31, %c0_32], %46 {strides = array<i32>} : memref<4x8x16xf32, #tpu.memory_space<vmem>>, vector<1x8x16xf32>,
    %47 = vector.extract_strided_slice %2 {offsets = [0, 176], sizes = [8, 16], strides = [1, 1]} : vector<8x192xf32> to vector<8x16xf32>
    %c3_33 = arith.constant 3 : index
    %c0_34 = arith.constant 0 : index
    %c0_35 = arith.constant 0 : index
    %48 = vector.load %arg5[%c3_33, %c0_34, %c0_35] : memref<4x8x16xf32, #tpu.memory_space<vmem>>, vector<1x8x16xf32>
    %49 = vector.shape_cast %48 : vector<1x8x16xf32> to vector<8x16xf32>
    %50 = vector.shape_cast %47 : vector<8x16xf32> to vector<1x8x16xf32>
    tpu.vector_store %arg5[%c3_33, %c0_34, %c0_35], %50 {strides = array<i32>} : memref<4x8x16xf32, #tpu.memory_space<vmem>>, vector<1x8x16xf32>,
    return
  }
  func.func @transform_0(%arg0: i32) -> (i32, i32) {
    %c0_i32 = arith.constant 0 : i32
    %c0_i32_0 = arith.constant 0 : i32
    return %arg0, %c0_i32 : i32, i32
  }
  func.func @transform_1(%arg0: i32) -> (i32, i32) {
    %c0_i32 = arith.constant 0 : i32
    %c0_i32_0 = arith.constant 0 : i32
    %c0_i32_1 = arith.constant 0 : i32
    return %c0_i32, %c0_i32_0 : i32, i32
  }
  func.func @transform_2(%arg0: i32) -> (i32, i32, i32) {
    %c0_i32 = arith.constant 0 : i32
    %c0_i32_0 = arith.constant 0 : i32
    %c0_i32_1 = arith.constant 0 : i32
    return %c0_i32, %arg0, %c0_i32_0 : i32, i32, i32
  }
  func.func @transform_3(%arg0: i32) -> (i32, i32, i32) {
    %c0_i32 = arith.constant 0 : i32
    %c0_i32_0 = arith.constant 0 : i32
    %c0_i32_1 = arith.constant 0 : i32
    return %c0_i32, %arg0, %c0_i32_0 : i32, i32, i32
  }
  func.func @transform_4(%arg0: i32) -> (i32, i32, i32) {
    %c0_i32 = arith.constant 0 : i32
    %c0_i32_0 = arith.constant 0 : i32
    %c0_i32_1 = arith.constant 0 : i32
    return %c0_i32, %arg0, %c0_i32_0 : i32, i32, i32
  }
}

</mosaic_0001>

<bundles_post_ra>
// kernel: tpu_custom_call.1
= control target key start
LH: loop header
LB: loop body
LE: loop exit
PB: predicated region body
PF: predicated region fallthrough
CT: control target
= control target key end

     0   :  { %10 = vsyncpa [#allocation3], 0  ;;  %s422_s0 = inlined_call_operand.hbm [shape: f32[8,32], index: 0, kind: input, shape index: {}]   ;;  %s423_s1 = inlined_call_operand.hbm [shape: f32[32,192], index: 1, kind: input, shape index: {}]   ;;  %s424_s2 = inlined_call_operand.hbm [shape: f32[4,8,16], index: 2, kind: output, shape index: {0}]   ;;  %s425_s3 = inlined_call_operand.hbm [shape: f32[4,8,16], index: 3, kind: output, shape index: {1}]   ;;  %s426_s4 = inlined_call_operand.hbm [shape: f32[4,8,16], index: 4, kind: output, shape index: {2}]  }
   0x1   :  { %11 = vsyncpa [#allocation6], 0 }
   0x2   :  { %12 = vsyncpa [#allocation4], 0 }
   0x3   :  { %13 = vsyncpa [#allocation9], 0  ;;  %s19_s17 = sshll.u32 %s422_s0, 4  ;;  %s353_s18 = smov [#allocation2]   ;;  %s20_s17 = int_to_ptr.hbm [resolvable:$true] %s19_s17 }
   0x4   :  { %s21_s19 = sshll.u32 %s353_s18, 4  ;;  %s29_s22 = sshll.u32 %s423_s1, 4  ;;  %s22_s19 = int_to_ptr.vmem [resolvable:$true] %s21_s19  ;;  %s30_s22 = int_to_ptr.hbm [resolvable:$true] %s29_s22 }
   0x5   :  { %24 = dma.hbm_to_vmem [thread:$0]  %s20_s17, 128, %s22_s19, [#allocation3]  }
   0x6   :  { %s354_s23 = smov [#allocation5]   ;;  %s355_s25 = smov 256  }
   0x7   :  { %s31_s24 = sshll.u32 %s354_s23, 4  ;;  %s356_s26 = smov 16   ;;  %s32_s24 = int_to_ptr.vmem [resolvable:$true] %s31_s24 }
   0x8   :  { %37 = dma.hbm_to_vmem [thread:$0]  %s30_s22, 1024, %s32_s24, [#allocation6], %s355_s25, %s355_s25, %s356_s26  }
   0x9   :  { %345 = dma.done.wait [#allocation3], 128  }
   0xa   :  { %346 = vsyncadd [#allocation3], 4294967168 }
   0xb   :  { %347 = dma.done.wait [#allocation6], 1024  }
   0xc   :  { %348 = vsyncadd [#allocation6], 4294966272  ;;  %v53_v0 = vld [vmem:[#allocation5 + $0x30] sm:$0xff]  ;;  %v51_v1 = vld [vmem:[#allocation5 + $0x20] sm:$0xff]  ;;  %vm55_vm0 = vcmask 261120   ;;  %vm99_vm1 = vcmask 130048  }
   0xd   :  { %71 = vmatpush.msra.mxu0 %v53_v0  ;;  %v54_v2 = vld [vmem:[#allocation5 + $0x38] sm:$0xff]  ;;  %v49_v3 = vld [vmem:[#allocation5 + $0x10] sm:$0xff]  ;;  %v52_v4 = vld [vmem:[#allocation5 + $0x28] sm:$0xff]  ;;  %s357_s0 = smov 112   ;;  %s358_s1 = smov 32  }
   0xe   :  { %91 = vmatpush.msra.mxu1 %v54_v2  ;;  %v50_v5 = vld [vmem:[#allocation5 + $0x18] sm:$0xff]  ;;  %v47_v6 = vld [vmem:[#allocation5] sm:$0xff]  ;;  %v48_v8 = vld [vmem:[#allocation5 + $0x8] sm:$0xff]  ;;  %s359_s27 = smov 64   ;;  %s360_s28 = smov 48  }
   0xf   :  { %72 = vmatpush.msra.mxu0 %v51_v1  ;;  %v46_v7 = vld [vmem:[#allocation2] sm:$0xff]  ;;  %s361_s29 = smov 80   ;;  %s362_s30 = smov 96  }
  0x10   :  { %92 = vmatpush.msra.mxu1 %v52_v4  ;;  %s363_s5 = smov [#allocation8]   ;;  %s172_s9 = sshll.u32 %s425_s3, 4  ;;  %s173_s9 = int_to_ptr.hbm [resolvable:$true] %s172_s9 }
  0x11   :  { %73 = vmatpush.msra.mxu0 %v49_v3  ;;  %s170_s6 = sshll.u32 %s363_s5, 4  ;;  %s364_s10 = smov 128   ;;  %s171_s6 = int_to_ptr.vmem [resolvable:$true] %s170_s6 }
  0x12   :  { %93 = vmatpush.msra.mxu1 %v50_v5  ;;  %s365_s11 = smov 8   ;;  %s366_s12 = smov [#allocation7]  }
  0x13   :  { %74 = vmatpush.msra.mxu0 %v47_v6  ;;  %s157_s13 = sshll.u32 %s366_s12, 4  ;;  %s159_s16 = sshll.u32 %s424_s2, 4  ;;  %s158_s13 = int_to_ptr.vmem [resolvable:$true] %s157_s13  ;;  %s160_s16 = int_to_ptr.hbm [resolvable:$true] %s159_s16 }
  0x14   :  { %208 = vmatmul.msk.f32.vlgmr.msra.gmra.mxu0 %vm55_vm0, %v46_v7  ;;  %94 = vmatpush.msra.mxu1 %v48_v8  ;;  %s367_s3 = smov [#allocation10]   ;;  %s185_s20 = sshll.u32 %s426_s4, 4  ;;  %s186_s20 = int_to_ptr.hbm [resolvable:$true] %s185_s20 }
  0x15   :  { %209 = vmatmul.msk.f32.vlgmr.msra.gmra.mxu1 %vm55_vm0, %v46_v7  ;;  %s183_s17 = sshll.u32 %s367_s3, 4  ;;  %s184_s17 = int_to_ptr.vmem [resolvable:$true] %s183_s17 }
  0x91   :  { %v76_v9 = vpop.f32.mrf.mxu0 }
  0x92   :  { %100 = vst.msk [vmem:[#allocation7] sm:$0xff] %vm99_vm1, %v76_v9  ;;  %107 = vrot.lane.b32.xlu2 %v76_v9, %s357_s0  ;;  %128 = vrot.lane.b32.xlu1 %v76_v9, %s358_s1  ;;  %v96_v10 = vpop.f32.mrf.mxu1 }
  0x93   :  { %102 = vrot.lane.b32.xlu0 %v76_v9, %s359_s27  ;;  %106 = vst.msk [vmem:[#allocation10] sm:$0xff] %vm99_vm1, %v96_v10 }
  0x9a   :  { %118 = vrot.lane.b32.xlu2 %v96_v10, %s357_s0  ;;  %143 = vrot.lane.b32.xlu1 %v76_v9, %s356_s26 }
  0x9b   :  { %112 = vrot.lane.b32.xlu0 %v76_v9, %s360_s28 }
  0xa2   :  { %138 = vrot.lane.b32.xlu2 %v76_v9, %s361_s29  ;;  %133 = vrot.lane.b32.xlu1 %v96_v10, %s362_s30 }
  0xa3   :  { %123 = vrot.lane.b32.xlu0 %v76_v9, %s362_s30 }
  0xab   :  { %148 = vrot.lane.b32.xlu0 %v96_v10, %s361_s29 }
  0xec   :  { %v108_v11 = vpop.permute.xlu2 %107 }
  0xed   :  { %111 = vst.msk [vmem:[#allocation7 + $0x8] sm:$0xff] %vm99_vm1, %v108_v11 }
  0xf4   :  { %v119_v12 = vpop.permute.xlu2 %118 }
  0xf5   :  { %122 = vst.msk [vmem:[#allocation10 + $0x8] sm:$0xff] %vm99_vm1, %v119_v12 }
  0xfc   :  { %v139_v13 = vpop.permute.xlu2 %138 }
  0xfd   :  { %142 = vst.msk [vmem:[#allocation7 + $0x18] sm:$0xff] %vm99_vm1, %v139_v13 }
 0x104   :  { %v129_v14 = vpop.permute.xlu1 %128 }
 0x105   :  { %132 = vst.msk [vmem:[#allocation8 + $0x10] sm:$0xff] %vm99_vm1, %v129_v14  ;;  %v103_v15 = vpop.permute.xlu0 %102 }
 0x106   :  { %105 = vst.msk [vmem:[#allocation8] sm:$0xff] %vm99_vm1, %v103_v15 }
 0x10c   :  { %v144_v16 = vpop.permute.xlu1 %143 }
 0x10d   :  { %147 = vst.msk [vmem:[#allocation8 + $0x18] sm:$0xff] %vm99_vm1, %v144_v16  ;;  %v113_v17 = vpop.permute.xlu0 %112 }
 0x10e   :  { %116 = vst.msk [vmem:[#allocation8 + $0x8] sm:$0xff] %vm99_vm1, %v113_v17 }
 0x10f   :  { %178 = dma.vmem_to_hbm [thread:$0]  %s171_s6, 512, %s173_s9, [#allocation9], %s364_s10, %s364_s10, %s365_s11  }
 0x114   :  { %v134_v18 = vpop.permute.xlu1 %133 }
 0x115   :  { %v124_v19 = vpop.permute.xlu0 %123  ;;  %137 = vst.msk [vmem:[#allocation10 + $0x10] sm:$0xff] %vm99_vm1, %v134_v18 }
 0x116   :  { %127 = vst.msk [vmem:[#allocation7 + $0x10] sm:$0xff] %vm99_vm1, %v124_v19 }
 0x117   :  { %165 = dma.vmem_to_hbm [thread:$0]  %s158_s13, 512, %s160_s16, [#allocation4], %s364_s10, %s364_s10, %s365_s11  }
 0x11d   :  { %v149_v20 = vpop.permute.xlu0 %148 }
 0x11e   :  { %152 = vst.msk [vmem:[#allocation10 + $0x18] sm:$0xff] %vm99_vm1, %v149_v20 }
 0x11f   :  { %191 = dma.vmem_to_hbm [thread:$0]  %s184_s17, 512, %s186_s20, [#allocation9], %s364_s10, %s364_s10, %s365_s11  }
 0x120   :  { %349 = dma.done.wait [#allocation4], 512  }
 0x121   :  { %350 = vsyncadd [#allocation4], 4294966784 }
 0x122   :  { %351 = dma.done.wait [#allocation9], 1024  }
 0x123   :  { %352 = vsyncadd [#allocation9], 4294966272 }
 0x124   :  { %204 = vsyncpa [#allocation3], 1 }
 0x125   :  { %205 = vsyncpa [#allocation6], 1 }
 0x126   :  { %206 = vsyncpa [#allocation4], 1 }
 0x127   :  { %207 = vsyncpa [#allocation9], 1 }

</bundles_post_ra>
